<compile_context>
chip_gen: v5e
topology: v5e:2x2
jax: 0.10.0
libtpu: 0.0.40
codegen_flags: <defaults>
</compile_context>

<pallas_src>
import jax
import jax.numpy as jnp
from jax.experimental import pallas as pl
from jax.experimental.pallas import tpu as pltpu


def _assemble_shared_ctx_kernel(prefix_ref, ctx_ref, suffix_ref, out_ref):
    # prefix_ref : (TC, 1, D)        SOS token embedding for TC classes
    # ctx_ref    : (n_ctx, D)        shared learnable context (grid-invariant)
    # suffix_ref : (TC, suf_len, D)  suffix embeddings for TC classes
    # out_ref    : (TC, seq, D)      assembled prompts for TC classes
    tc = out_ref.shape[0]
    n_ctx, d = ctx_ref.shape
    # Hoisted broadcast: exactly one broadcast_in_dim per grid step.
    ctx_b = jnp.broadcast_to(ctx_ref[...][None, :, :], (tc, n_ctx, d))
    # Single unmasked full-tile store (no masked vst at unaligned seq offsets).
    out_ref[...] = jnp.concatenate(
        [prefix_ref[...], ctx_b, suffix_ref[...]], axis=1
    ).astype(out_ref.dtype)


def _assemble_csc_ctx_kernel(prefix_ref, ctx_ref, suffix_ref, out_ref):
    # Class-specific context: ctx_ref is (TC, n_ctx, D); no broadcast needed.
    out_ref[...] = jnp.concatenate(
        [prefix_ref[...], ctx_ref[...], suffix_ref[...]], axis=1
    ).astype(out_ref.dtype)


# Conservative double-buffered tile-data budget: fits v7x (64 MiB physical) and
# is trivially fine on v5e/v6e (128 MiB VMEM).
_TILE_VMEM_BUDGET_BYTES = 32 * 1024 * 1024
_MAX_BLOCK_CLASSES = 64


def _pick_block_classes(n_cls, seq, suf_len, n_ctx, ctx_dim, itemsize, csc):
    # Per-class bytes resident (double-buffered): prefix (1 row) + suffix
    # (suf_len rows) (+ per-class ctx rows if CSC) inputs + full output tile.
    rows = 1 + suf_len + seq + (n_ctx if csc else 0)
    per_class = 2 * rows * ctx_dim * itemsize
    tc = max(1, _TILE_VMEM_BUDGET_BYTES // max(per_class, 1))
    return int(min(n_cls, tc, _MAX_BLOCK_CLASSES))


def prompt_learner_forward(ctx, token_prefix, token_suffix, block_classes=None):
    """Pallas implementation of PromptLearner_domain.forward() ('end' position).

    ctx:          (n_ctx, ctx_dim)  or  (n_cls, n_ctx, ctx_dim)  (CSC)
    token_prefix: (n_cls, 1, ctx_dim)
    token_suffix: (n_cls, suf_len, ctx_dim)
    returns:      (n_cls, 1 + n_ctx + suf_len, ctx_dim)
    """
    csc = ctx.ndim == 3
    n_ctx, ctx_dim = ctx.shape[-2], ctx.shape[-1]
    n_cls = token_prefix.shape[0]
    suf_len = token_suffix.shape[1]
    seq = 1 + n_ctx + suf_len

    if block_classes is None:
        block_classes = _pick_block_classes(
            n_cls, seq, suf_len, n_ctx, ctx_dim,
            jnp.dtype(ctx.dtype).itemsize, csc)
    tc = int(min(block_classes, n_cls))
    grid = (pl.cdiv(n_cls, tc),)

    if csc:
        kernel = _assemble_csc_ctx_kernel
        ctx_spec = pl.BlockSpec((tc, n_ctx, ctx_dim), lambda i: (i, 0, 0))
    else:
        kernel = _assemble_shared_ctx_kernel
        # Constant index_map -> fetched once, never re-DMA'd across grid steps.
        ctx_spec = pl.BlockSpec((n_ctx, ctx_dim), lambda i: (0, 0))

    grid_spec = pltpu.PrefetchScalarGridSpec(
        num_scalar_prefetch=0,
        grid=grid,
        in_specs=[
            # TC classes of SOS embeddings per step.
            pl.BlockSpec((tc, 1, ctx_dim), lambda i: (i, 0, 0)),
            ctx_spec,
            # TC classes of suffix embeddings per step.
            pl.BlockSpec((tc, suf_len, ctx_dim), lambda i: (i, 0, 0)),
        ],
        out_specs=pl.BlockSpec((tc, seq, ctx_dim), lambda i: (i, 0, 0)),
    )

    return pl.pallas_call(
        kernel,
        out_shape=jax.ShapeDtypeStruct((n_cls, seq, ctx_dim), ctx.dtype),
        grid_spec=grid_spec,
        compiler_params=pltpu.CompilerParams(
            dimension_semantics=("parallel",),
            vmem_limit_bytes=48 * 1024 * 1024,
        ),
    )(token_prefix, ctx, token_suffix)


if __name__ == "__main__":
    # Small, deterministic synthetic setup consistent with the module's __init__:
    #   n_cls classes, n_ctx learnable context tokens, ctx_dim embedding width,
    #   total tokenized length seq (CLIP uses 77; small value here).
    n_cls = 4
    n_ctx = 8
    ctx_dim = 128
    seq = 24                      # 1 (SOS) + n_ctx + suffix
    suf_len = seq - 1 - n_ctx     # = 15

    key = jax.random.PRNGKey(0)
    k_ctx, k_emb, k_csc = jax.random.split(key, 3)

    # ctx ~ N(0, 0.02) as in nn.init.normal_(ctx_vectors, std=0.02)
    ctx = (0.02 * jax.random.normal(k_ctx, (n_ctx, ctx_dim))).astype(jnp.float32)

    # Synthetic "token embedding" of the tokenized prompts, split into
    # prefix (SOS) and suffix (class name + EOS + padding) buffers.
    embedding = jax.random.normal(k_emb, (n_cls, seq, ctx_dim), dtype=jnp.float32)
    token_prefix = embedding[:, :1, :]
    token_suffix = embedding[:, 1 + n_ctx:, :]

    # Pure-JAX reference of the PyTorch forward ('end' branch, shared ctx).
    ctx_exp = jnp.broadcast_to(ctx[None, :, :], (n_cls, n_ctx, ctx_dim))
    ref = jnp.concatenate([token_prefix, ctx_exp, token_suffix], axis=1)

    # 1) Default path: all classes fit in one block -> single grid step.
    prompts = prompt_learner_forward(ctx, token_prefix, token_suffix)
    prompts = jax.block_until_ready(prompts)
    assert prompts.shape == (n_cls, seq, ctx_dim)
    assert jnp.allclose(prompts, ref)

    # 2) Multi-step path: 2 classes per block -> 2 grid steps, same result.
    prompts2 = prompt_learner_forward(ctx, token_prefix, token_suffix,
                                      block_classes=2)
    prompts2 = jax.block_until_ready(prompts2)
    assert jnp.allclose(prompts2, ref)

    # 3) Class-specific-context (CSC) path: ctx has shape (n_cls, n_ctx, ctx_dim).
    ctx_csc = (0.02 * jax.random.normal(k_csc, (n_cls, n_ctx, ctx_dim))
               ).astype(jnp.float32)
    ref_csc = jnp.concatenate([token_prefix, ctx_csc, token_suffix], axis=1)
    prompts3 = prompt_learner_forward(ctx_csc, token_prefix, token_suffix,
                                      block_classes=2)
    prompts3 = jax.block_until_ready(prompts3)
    assert jnp.allclose(prompts3, ref_csc)

    # 4) bfloat16 path (CLIP-style reduced-precision dtype on TPU).
    ctx_bf = ctx.astype(jnp.bfloat16)
    pre_bf = token_prefix.astype(jnp.bfloat16)
    suf_bf = token_suffix.astype(jnp.bfloat16)
    ref_bf = jnp.concatenate(
        [pre_bf, jnp.broadcast_to(ctx_bf[None], (n_cls, n_ctx, ctx_dim)), suf_bf],
        axis=1)
    prompts4 = prompt_learner_forward(ctx_bf, pre_bf, suf_bf)
    prompts4 = jax.block_until_ready(prompts4)
    assert prompts4.dtype == jnp.bfloat16
    assert jnp.allclose(prompts4.astype(jnp.float32), ref_bf.astype(jnp.float32))

    print("KERNEL_OK")
</pallas_src>

<mosaic_0001>
module attributes {stable_mosaic.version = 11 : i64} {
  func.func @_assemble_shared_ctx_kernel(%arg0: i32, %arg1: memref<4x1x128xf32, #tpu.memory_space<vmem>>, %arg2: memref<8x128xf32, #tpu.memory_space<vmem>>, %arg3: memref<4x15x128xf32, #tpu.memory_space<vmem>>, %arg4: memref<4x24x128xf32, #tpu.memory_space<vmem>>) attributes {dimension_semantics = [#tpu.dimension_semantics<parallel>], iteration_bounds = array<i64: 1>, scalar_prefetch = 0 : i64, scratch_operands = 0 : i64, tpu.core_type = #tpu.core_type<tc>, window_params = [{transform_indices = @transform_0, window_bounds = array<i64: 4, 1, 128>}, {pipeline_mode = #tpu.pipeline_mode<synchronous>, transform_indices = @transform_1, window_bounds = array<i64: 8, 128>}, {transform_indices = @transform_2, window_bounds = array<i64: 4, 15, 128>}, {transform_indices = @transform_3, window_bounds = array<i64: 4, 24, 128>}]} {
    %c0 = arith.constant 0 : index
    %c0_0 = arith.constant 0 : index
    %0 = vector.load %arg2[%c0, %c0_0] : memref<8x128xf32, #tpu.memory_space<vmem>>, vector<8x128xf32>
    %1 = vector.shape_cast %0 : vector<8x128xf32> to vector<1x8x128xf32>
    %2 = vector.shape_cast %1 : vector<1x8x128xf32> to vector<1x8x128xf32>
    %3 = vector.broadcast %2 : vector<1x8x128xf32> to vector<4x8x128xf32>
    %c0_1 = arith.constant 0 : index
    %c0_2 = arith.constant 0 : index
    %c0_3 = arith.constant 0 : index
    %4 = vector.load %arg1[%c0_1, %c0_2, %c0_3] : memref<4x1x128xf32, #tpu.memory_space<vmem>>, vector<4x1x128xf32>
    %c0_4 = arith.constant 0 : index
    %c0_5 = arith.constant 0 : index
    %c0_6 = arith.constant 0 : index
    %5 = vector.load %arg3[%c0_4, %c0_5, %c0_6] : memref<4x15x128xf32, #tpu.memory_space<vmem>>, vector<4x15x128xf32>
    %6 = tpu.concatenate %4, %3, %5 in 1 : vector<4x1x128xf32>, vector<4x8x128xf32>, vector<4x15x128xf32> -> vector<4x24x128xf32>
    %c0_7 = arith.constant 0 : index
    %c0_8 = arith.constant 0 : index
    %c0_9 = arith.constant 0 : index
    %7 = vector.load %arg4[%c0_7, %c0_8, %c0_9] : memref<4x24x128xf32, #tpu.memory_space<vmem>>, vector<4x24x128xf32>
    tpu.vector_store %arg4[%c0_7, %c0_8, %c0_9], %6 {strides = array<i32>} : memref<4x24x128xf32, #tpu.memory_space<vmem>>, vector<4x24x128xf32>,
    return
  }
  func.func @transform_0(%arg0: i32) -> (i32, i32, i32) {
    %c0_i32 = arith.constant 0 : i32
    %c0_i32_0 = arith.constant 0 : i32
    %c0_i32_1 = arith.constant 0 : i32
    return %arg0, %c0_i32, %c0_i32_0 : i32, i32, i32
  }
  func.func @transform_1(%arg0: i32) -> (i32, i32) {
    %c0_i32 = arith.constant 0 : i32
    %c0_i32_0 = arith.constant 0 : i32
    %c0_i32_1 = arith.constant 0 : i32
    return %c0_i32, %c0_i32_0 : i32, i32
  }
  func.func @transform_2(%arg0: i32) -> (i32, i32, i32) {
    %c0_i32 = arith.constant 0 : i32
    %c0_i32_0 = arith.constant 0 : i32
    %c0_i32_1 = arith.constant 0 : i32
    return %arg0, %c0_i32, %c0_i32_0 : i32, i32, i32
  }
  func.func @transform_3(%arg0: i32) -> (i32, i32, i32) {
    %c0_i32 = arith.constant 0 : i32
    %c0_i32_0 = arith.constant 0 : i32
    %c0_i32_1 = arith.constant 0 : i32
    return %arg0, %c0_i32, %c0_i32_0 : i32, i32, i32
  }
}

</mosaic_0001>

<bundles_post_ra>
// kernel: tpu_custom_call.1
= control target key start
LH: loop header
LB: loop body
LE: loop exit
PB: predicated region body
PF: predicated region fallthrough
CT: control target
= control target key end

     0   :  { %vm39_vm0 = vcmask 1040384   ;;  %s204_s0 = inlined_call_operand.vmem [shape: f32[4,1,128], index: 0, kind: input, shape index: {}]   ;;  %s205_s1 = inlined_call_operand.vmem [shape: f32[8,128], index: 1, kind: input, shape index: {}]   ;;  %s206_s2 = inlined_call_operand.vmem [shape: f32[4,15,128], index: 2, kind: input, shape index: {}]   ;;  %s207_s3 = inlined_call_operand.hbm [shape: f32[4,24,128], index: 3, kind: output, shape index: {}]  }
   0x1   :  { %v15_v0 = vld [vmem:[%s205_s1] sm:$0xff]  ;;  %v21_v5 = vld [vmem:[%s206_s2 + $0x8] sm:$0x7f]  ;;  %v22_v8 = vld [vmem:[%s206_s2 + $0x10] sm:$0xff] }
   0x2   :  { %v16_v1 = vld [vmem:[%s204_s0] sm:$0x1]  ;;  %v29_v3 = vrot.slane %v15_v0, 7  ;;  %v17_v6 = vld [vmem:[%s204_s0 + $0x1] sm:$0x1]  ;;  %v41_v7 = vrot.slane %v21_v5, 7 }
   0x3   :  { %v20_v2 = vld [vmem:[%s206_s2] sm:$0xff]  ;;  %v23_v9 = vld [vmem:[%s206_s2 + $0x18] sm:$0x7f]  ;;  %v43_v12 = vrot.slane %v22_v8, 7  ;;  %v25_v14 = vld [vmem:[%s206_s2 + $0x28] sm:$0x7f] }
   0x4   :  { %v40_v4 = vrot.slane %v20_v2, 7  ;;  %v60_v10 = vsel %vm39_vm0, %v16_v1, %v29_v3  ;;  %v24_v13 = vld [vmem:[%s206_s2 + $0x20] sm:$0xff]  ;;  %v61_v16 = vsel %vm39_vm0, %v17_v6, %v29_v3  ;;  %v44_v17 = vrot.slane %v23_v9, 7  ;;  %v26_v20 = vld [vmem:[%s206_s2 + $0x30] sm:$0xff]  ;;  %v27_v23 = vld [vmem:[%s206_s2 + $0x38] sm:$0x7f] }
   0x5   :  { %68 = vst [vmem:[#allocation2] sm:$0xff] %v60_v10  ;;  %v18_v18 = vld [vmem:[%s204_s0 + $0x2] sm:$0x1]  ;;  %v46_v19 = vrot.slane %v24_v13, 7  ;;  %v65_v21 = vsel %vm39_vm0, %v29_v3, %v43_v12  ;;  %v47_v22 = vrot.slane %v25_v14, 7 }
   0x6   :  { %v64_v11 = vsel %vm39_vm0, %v29_v3, %v40_v4  ;;  %v42_v15 = vsel %vm39_vm0, %v40_v4, %v41_v7 }
   0x7   :  { %69 = vst [vmem:[#allocation2 + $0x8] sm:$0xff] %v64_v11 }
   0x8   :  { %8 = vsyncpa [#allocation3], 0  ;;  %70 = vst [vmem:[#allocation2 + $0x10] sm:$0xff] %v42_v15  ;;  %v45_v24 = vsel %vm39_vm0, %v43_v12, %v44_v17  ;;  %v62_v25 = vsel %vm39_vm0, %v18_v18, %v29_v3  ;;  %v19_v26 = vld [vmem:[%s204_s0 + $0x3] sm:$0x1]  ;;  %v49_v27 = vrot.slane %v26_v20, 7  ;;  %v66_v28 = vsel %vm39_vm0, %v29_v3, %v46_v19 }
   0x9   :  { %71 = vst [vmem:[#allocation2 + $0x18] sm:$0xff] %v61_v16  ;;  %v50_v29 = vrot.slane %v27_v23, 7  ;;  %v48_v30 = vsel %vm39_vm0, %v46_v19, %v47_v22  ;;  %s127_s2 = smov [#allocation2]   ;;  %s86_s13 = sshll.u32 %s207_s3, 4  ;;  %v63_v31 = vsel %vm39_vm0, %v19_v26, %v29_v3  ;;  %s87_s13 = int_to_ptr.hbm [resolvable:$true] %s86_s13 }
   0xa   :  { %72 = vst [vmem:[#allocation2 + $0x20] sm:$0xff] %v65_v21  ;;  %s84_s10 = sshll.u32 %s127_s2, 4  ;;  %v67_v32 = vsel %vm39_vm0, %v29_v3, %v49_v27  ;;  %s128_s0 = smov 128   ;;  %s85_s10 = int_to_ptr.vmem [resolvable:$true] %s84_s10 }
   0xb   :  { %73 = vst [vmem:[#allocation2 + $0x28] sm:$0xff] %v45_v24  ;;  %v51_v33 = vsel %vm39_vm0, %v49_v27, %v50_v29  ;;  %s129_s14 = smov 8  }
   0xc   :  { %74 = vst [vmem:[#allocation2 + $0x30] sm:$0xff] %v62_v25 }
   0xd   :  { %75 = vst [vmem:[#allocation2 + $0x38] sm:$0xff] %v66_v28 }
   0xe   :  { %76 = vst [vmem:[#allocation2 + $0x40] sm:$0xff] %v48_v30 }
   0xf   :  { %77 = vst [vmem:[#allocation2 + $0x48] sm:$0xff] %v63_v31 }
  0x10   :  { %78 = vst [vmem:[#allocation2 + $0x50] sm:$0xff] %v67_v32 }
  0x11   :  { %79 = vst [vmem:[#allocation2 + $0x58] sm:$0xff] %v51_v33 }
  0x12   :  { %92 = dma.vmem_to_hbm [thread:$0]  %s85_s10, 1536, %s87_s13, [#allocation3], %s128_s0, %s128_s0, %s129_s14  }
  0x13   :  { %125 = dma.done.wait [#allocation3], 1536  }
  0x14   :  { %126 = vsyncadd [#allocation3], 4294965760 }
  0x15   :  { %97 = vsyncpa [#allocation3], 1 }

</bundles_post_ra>
